<compile_context>
chip_gen: v6e
topology: v6e:2x2x1
jax: 0.10.0
libtpu: 0.0.40
codegen_flags: <defaults>
</compile_context>

<pallas_src>
import functools

import jax
import jax.numpy as jnp
from jax.experimental import pallas as pl
from jax.experimental.pallas import tpu as pltpu


def _round_up(x: int, m: int) -> int:
    return ((x + m - 1) // m) * m


# --------------------------------------------------------------------------
# Kernel 1: ecs (class indicator matrix), core of _prepare_().
#   y_unique : scalar-prefetch SMEM, (n_classes,) int32
#   y        : (1, n_pad) int32, tiled (1, tile_n) over samples
#   ecs      : (n_classes, n_pad) float32, tiled (n_classes, tile_n)
# Memory-write bound; tiling over samples gives double-buffered DMA and
# shards across cores on v7x.
# --------------------------------------------------------------------------
def _ecs_kernel(yu_ref, y_ref, ecs_ref):
    y = y_ref[...]                               # (1, tile_n) int32
    n_classes = ecs_ref.shape[0]
    # Build the (n_classes, 1) class-value column from SMEM scalars (no extra
    # VMEM input stream; splats come from sregs on the VPU).
    cls = jax.lax.broadcasted_iota(jnp.int32, (n_classes, 1), 0)
    yu_col = jnp.zeros((n_classes, 1), jnp.int32)
    for c in range(n_classes):                   # n_classes is small & static
        yu_col = jnp.where(cls == c, yu_ref[c], yu_col)
    ecs_ref[...] = (yu_col == y).astype(ecs_ref.dtype)


def compute_ecs(y: jax.Array, y_unique: jax.Array) -> jax.Array:
    n_samples = int(y.shape[0])
    n_classes = int(y_unique.shape[0])

    n_pad = _round_up(n_samples, 128)
    tile_n = min(512, n_pad)
    n_pad = _round_up(n_pad, tile_n)

    y2 = jnp.pad(y.astype(jnp.int32), (0, n_pad - n_samples)).reshape(1, n_pad)
    yu = y_unique.astype(jnp.int32).reshape(n_classes)

    grid = (n_pad // tile_n,)
    ecs_pad = pl.pallas_call(
        _ecs_kernel,
        out_shape=jax.ShapeDtypeStruct((n_classes, n_pad), jnp.float32),
        grid_spec=pltpu.PrefetchScalarGridSpec(
            num_scalar_prefetch=1,
            grid=grid,
            in_specs=[pl.BlockSpec((1, tile_n), lambda i, yu_r: (0, i))],
            out_specs=pl.BlockSpec((n_classes, tile_n), lambda i, yu_r: (0, i)),
        ),
        compiler_params=pltpu.CompilerParams(
            dimension_semantics=("parallel",),
        ),
        cost_estimate=pl.CostEstimate(
            flops=n_classes * n_pad,
            transcendentals=0,
            bytes_accessed=4 * (n_pad + n_classes * n_pad),
        ),
    )(yu, y2)
    return ecs_pad[:, :n_samples]


# --------------------------------------------------------------------------
# Kernel 2: linear projector  Z = X @ W   (transform()).
#   Grid (M/tm, N/tn, K/tk), K last as the reduction ("arbitrary") axis,
#   f32 accumulator in VMEM scratch, lane-dense (>=128) padded N.
# --------------------------------------------------------------------------
def _matmul_kernel(x_ref, w_ref, o_ref, acc_ref):
    @pl.when(pl.program_id(2) == 0)
    def _():
        acc_ref[...] = jnp.zeros_like(acc_ref)

    acc_ref[...] += jnp.dot(
        x_ref[...], w_ref[...], preferred_element_type=jnp.float32
    )

    @pl.when(pl.program_id(2) == pl.num_programs(2) - 1)
    def _():
        o_ref[...] = acc_ref[...].astype(o_ref.dtype)


def projector_transform(X: jax.Array, W: jax.Array) -> jax.Array:
    M, K = int(X.shape[0]), int(X.shape[1])
    N = int(W.shape[1])

    # Tile sizes: (8,128)-aligned, capped so double-buffered tiles stay tiny
    # relative to the v7x 64 MiB VMEM (well under the scoped limit set below).
    tm = min(256, _round_up(M, 8))
    tk = min(512, _round_up(K, 128))
    tn = min(256, _round_up(N, 128))
    Mp, Kp, Np = _round_up(M, tm), _round_up(K, tk), _round_up(N, tn)

    Xp = jnp.pad(X.astype(jnp.float32), ((0, Mp - M), (0, Kp - K)))
    Wp = jnp.pad(W.astype(jnp.float32), ((0, Kp - K), (0, Np - N)))

    grid = (Mp // tm, Np // tn, Kp // tk)
    Zp = pl.pallas_call(
        _matmul_kernel,
        out_shape=jax.ShapeDtypeStruct((Mp, Np), jnp.float32),
        grid_spec=pltpu.PrefetchScalarGridSpec(
            num_scalar_prefetch=0,
            grid=grid,
            in_specs=[
                pl.BlockSpec((tm, tk), lambda i, j, k: (i, k)),
                pl.BlockSpec((tk, tn), lambda i, j, k: (k, j)),
            ],
            out_specs=pl.BlockSpec((tm, tn), lambda i, j, k: (i, j)),
            scratch_shapes=[pltpu.VMEM((tm, tn), jnp.float32)],
        ),
        compiler_params=pltpu.CompilerParams(
            dimension_semantics=("parallel", "parallel", "arbitrary"),
            vmem_limit_bytes=48 * 1024 * 1024,
        ),
        cost_estimate=pl.CostEstimate(
            flops=2 * Mp * Np * Kp,
            transcendentals=0,
            bytes_accessed=4 * (Mp * Kp + Kp * Np + Mp * Np),
        ),
    )(Xp, Wp)
    return Zp[:M, :N]


# --------------------------------------------------------------------------
# Python-side equivalent of GradientBasedSLAlgo
# --------------------------------------------------------------------------
class GradientBasedSLAlgoPallas:
    def __init__(self, projector_weight: jax.Array, reg="auto"):
        self.reg = reg
        self.projector_weight = projector_weight  # (dim, out_dim)
        self.is_prepared = False

    def _prepare_(self, X, y, y_unique=None):
        self._X = X
        self._y = y
        # TODO(synk): jnp.unique has data-dependent shape -> host-side only
        # (not jit-safe); pass y_unique explicitly when running under jit.
        self._y_unique = jnp.unique(y) if y_unique is None else y_unique
        self.ecs = compute_ecs(self._y, self._y_unique)        # Pallas kernel
        self.n_classes = int(self._y_unique.shape[0])
        self.n_samples = int(self._y.shape[0])
        self.ori_dim = int(self._X.shape[1])
        self.dim = int(self._X.shape[1])
        self.is_prepared = True

    def forward(self, X, y, y_unique=None):
        # Upstream GradientBasedSLAlgo.forward has an empty body (`pass`);
        # subclasses define the actual objective.  We run _prepare_ to match
        # the reproducible semantics and return None like the original.
        self._prepare_(X, y, y_unique)
        return None

    def transform(self, X):
        return projector_transform(X, self.projector_weight)   # Pallas kernel


if __name__ == "__main__":
    key = jax.random.PRNGKey(0)
    k_x, k_w = jax.random.split(key)

    n_samples, dim, out_dim, n_classes = 8, 32, 16, 4

    X = jax.random.normal(k_x, (n_samples, dim), dtype=jnp.float32)
    y = jnp.array([0, 1, 2, 3, 0, 1, 2, 3], dtype=jnp.int32)
    y_unique = jnp.arange(n_classes, dtype=jnp.int32)
    W = jax.random.normal(k_w, (dim, out_dim), dtype=jnp.float32) * 0.1

    algo = GradientBasedSLAlgoPallas(W)

    # forward() -> prepare (ecs kernel)
    algo.forward(X, y, y_unique)
    ecs = jax.block_until_ready(algo.ecs)

    # transform() -> tiled projector matmul kernel
    Z = jax.block_until_ready(algo.transform(X))

    # sanity checks against plain-JAX references
    ecs_ref = (y_unique[:, None] == y[None, :]).astype(jnp.float32)
    z_ref = X @ W
    assert ecs.shape == (n_classes, n_samples)
    assert Z.shape == (n_samples, out_dim)
    assert jnp.allclose(ecs, ecs_ref)
    assert jnp.allclose(Z, z_ref, atol=1e-5, rtol=1e-5)

    print("KERNEL_OK")
</pallas_src>

<mosaic_0001>
module attributes {stable_mosaic.version = 11 : i64} {
  func.func @_ecs_kernel(%arg0: i32, %arg1: memref<4xi32, #tpu.memory_space<smem>>, %arg2: memref<1x128xi32, #tpu.memory_space<vmem>>, %arg3: memref<4x128xf32, #tpu.memory_space<vmem>>) attributes {dimension_semantics = [#tpu.dimension_semantics<parallel>], iteration_bounds = array<i64: 1>, scalar_prefetch = 1 : i64, scratch_operands = 0 : i64, tpu.core_type = #tpu.core_type<tc>, window_params = [{transform_indices = @transform_0, window_bounds = array<i64: 1, 128>}, {transform_indices = @transform_1, window_bounds = array<i64: 4, 128>}]} {
    %c0 = arith.constant 0 : index
    %c0_0 = arith.constant 0 : index
    %0 = vector.load %arg2[%c0, %c0_0] : memref<1x128xi32, #tpu.memory_space<vmem>>, vector<1x128xi32>
    %1 = tpu.iota {dimensions = array<i32: 0>} : vector<4x1xi32>
    %c0_i32 = arith.constant 0 : i32
    %2 = vector.broadcast %c0_i32 : i32 to vector<4x1xi32>
    %c0_i32_1 = arith.constant 0 : i32
    %3 = vector.broadcast %c0_i32_1 : i32 to vector<4x1xi32>
    %4 = arith.cmpi eq, %1, %3 : vector<4x1xi32>
    %c0_2 = arith.constant 0 : index
    %5 = memref.load %arg1[%c0_2] : memref<4xi32, #tpu.memory_space<smem>>
    %6 = vector.broadcast %5 : i32 to vector<4x1xi32>
    %7 = arith.select %4, %6, %2 : vector<4x1xi1>, vector<4x1xi32>
    %c1_i32 = arith.constant 1 : i32
    %8 = vector.broadcast %c1_i32 : i32 to vector<4x1xi32>
    %9 = arith.cmpi eq, %1, %8 : vector<4x1xi32>
    %c1 = arith.constant 1 : index
    %10 = memref.load %arg1[%c1] : memref<4xi32, #tpu.memory_space<smem>>
    %11 = vector.broadcast %10 : i32 to vector<4x1xi32>
    %12 = arith.select %9, %11, %7 : vector<4x1xi1>, vector<4x1xi32>
    %c2_i32 = arith.constant 2 : i32
    %13 = vector.broadcast %c2_i32 : i32 to vector<4x1xi32>
    %14 = arith.cmpi eq, %1, %13 : vector<4x1xi32>
    %c2 = arith.constant 2 : index
    %15 = memref.load %arg1[%c2] : memref<4xi32, #tpu.memory_space<smem>>
    %16 = vector.broadcast %15 : i32 to vector<4x1xi32>
    %17 = arith.select %14, %16, %12 : vector<4x1xi1>, vector<4x1xi32>
    %c3_i32 = arith.constant 3 : i32
    %18 = vector.broadcast %c3_i32 : i32 to vector<4x1xi32>
    %19 = arith.cmpi eq, %1, %18 : vector<4x1xi32>
    %c3 = arith.constant 3 : index
    %20 = memref.load %arg1[%c3] : memref<4xi32, #tpu.memory_space<smem>>
    %21 = vector.broadcast %20 : i32 to vector<4x1xi32>
    %22 = arith.select %19, %21, %17 : vector<4x1xi1>, vector<4x1xi32>
    %23 = vector.broadcast %22 : vector<4x1xi32> to vector<4x128xi32>
    %24 = vector.broadcast %0 : vector<1x128xi32> to vector<4x128xi32>
    %25 = arith.cmpi eq, %23, %24 : vector<4x128xi32>
    %26 = arith.extui %25 : vector<4x128xi1> to vector<4x128xi32>
    %27 = arith.sitofp %26 : vector<4x128xi32> to vector<4x128xf32>
    %c0_3 = arith.constant 0 : index
    %c0_4 = arith.constant 0 : index
    %28 = vector.load %arg3[%c0_3, %c0_4] : memref<4x128xf32, #tpu.memory_space<vmem>>, vector<4x128xf32>
    tpu.vector_store %arg3[%c0_3, %c0_4], %27 {strides = array<i32>} : memref<4x128xf32, #tpu.memory_space<vmem>>, vector<4x128xf32>,
    return
  }
  func.func @transform_0(%arg0: i32, %arg1: memref<4xi32, #tpu.memory_space<smem>>) -> (i32, i32) {
    %c0_i32 = arith.constant 0 : i32
    %c0_i32_0 = arith.constant 0 : i32
    return %c0_i32, %arg0 : i32, i32
  }
  func.func @transform_1(%arg0: i32, %arg1: memref<4xi32, #tpu.memory_space<smem>>) -> (i32, i32) {
    %c0_i32 = arith.constant 0 : i32
    %c0_i32_0 = arith.constant 0 : i32
    return %c0_i32, %arg0 : i32, i32
  }
}

</mosaic_0001>

<bundles_post_ra>
// kernel: tpu_custom_call.1
= control target key start
LH: loop header
LB: loop body
LE: loop exit
PB: predicated region body
PF: predicated region fallthrough
CT: control target
= control target key end

     0   :  { %s95_s9 = smov [#allocation3]   ;;  %s122_s0 = inlined_call_operand.hbm [shape: s32[4], index: 0, kind: input, shape index: {}]   ;;  %s123_s1 = inlined_call_operand.vmem [shape: s32[1,128], index: 1, kind: input, shape index: {}]   ;;  %s124_s2 = inlined_call_operand.hbm [shape: f32[4,128], index: 2, kind: output, shape index: {}]  }
   0x1   :  { %8 = dma.hbm_to_smem %s122_s0, 16, %s95_s9, [#allocation2] }
   0x2   :  { %91 = dma.done.wait [#allocation2], 16 }
   0x3   :  { %92 = vsyncadd [#allocation2], 4294967280 }
   0x4   :  { %10 = sfence }
   0x5   :  { %v15_v0 = vlaneseq  ;;  %s18_s12 = sld [smem:[#allocation3]] }
   0x6   :  { %s55_s13 = sld [smem:[#allocation3 + $0x1]] }
   0x7   :  { %11 = vsyncpa [#allocation5], 0  ;;  %v16_v1 = vshrl.u32 %v15_v0, 7  ;;  %s56_s14 = sld [smem:[#allocation3 + $0x2]]  ;;  %v58_v5 = vld [vmem:[%s123_s1] ss:$0 sm:$0xff] }
   0x8   :  { %s57_s15 = sld [smem:[#allocation3 + $0x3]]  ;;  %s96_s0 = smov [#allocation4]   ;;  %v97_v11 = vmov 0.0  }
   0x9   :  { %vm17_vm0 = vcmp.eq.s32.totalorder %v16_v1, 0  ;;  %vm21_vm1 = vcmp.eq.s32.totalorder %v16_v1, 1  ;;  %vm25_vm2 = vcmp.eq.s32.totalorder %v16_v1, 2  ;;  %vm29_vm3 = vcmp.eq.s32.totalorder %v16_v1, 3  ;;  %s47_s18 = sshll.u32 %s96_s0, 4  ;;  %s48_s18 = int_to_ptr.vmem [resolvable:$true] %s47_s18 }
   0xa   :  { %s71_s19 = scalar_lea.vmem %s48_s18, 64  ;;  %p76_p1 = scmp.lt.s32.totalorder %s48_s18, %s48_s18 }
   0xb   :  { %v19_v2 = vstv %s18_s12  ;;  %p72_p0 = scmp.ne.s32.totalorder %s48_s18, %s71_s19  ;;  %p77_p2 = scmp.lt.s32.totalorder %s71_s19, %s71_s19 }
   0xc   :  { %v20_v3 = vsel %vm17_vm0, %v19_v2, 0  ;;  %v23_v4 = vstv %s55_s13 }
   0xd   :  { %v24_v6 = vsel %vm21_vm1, %v23_v4, %v20_v3  ;;  %v27_v7 = vstv %s56_s14  ;;  %p78_p3 = por %p77_p2, %p76_p1 }
   0xe   :  { %v28_v8 = vsel %vm25_vm2, %v27_v7, %v24_v6  ;;  %v31_v9 = vstv %s57_s15 }
   0xf   :  { %v32_v10 = vsel %vm29_vm3, %v31_v9, %v28_v8  ;;  %p79_p4 = pnand %p78_p3, %p72_p0 }
  0x10   :  { %vm37_vm4 = vcmp.eq.s32.totalorder %v32_v10, %v58_v5 }
  0x11   :  { %v59_v12 = vsel %vm37_vm4, 1.0, %v97_v11 }
  0x12   :  { %40 = vst [vmem:[#allocation4] sm:$0xf] %v59_v12 }
  0x13   :  { %82 = shalt.err (!%p79_p4)
}
  0x14   :  { %50 = dma.vmem_to_hbm [thread:$0]  %s48_s18, 64, %s124_s2, [#allocation5]  }
  0x15   :  { %93 = dma.done.wait [#allocation5], 64  }
  0x16   :  { %94 = vsyncadd [#allocation5], 4294967232 }
  0x17   :  { %54 = vsyncpa [#allocation5], 1 }

</bundles_post_ra>
